<compile_context>
chip_gen: v7x
topology: tpu7x:2x2x1
jax: 0.10.0
libtpu: 0.0.40
codegen_flags: <defaults>
</compile_context>

<pallas_src>
import functools

import jax
import jax.numpy as jnp
from jax.experimental import pallas as pl
from jax.experimental.pallas import tpu as pltpu


LANE = 128  # lane (last-dim) alignment for activations / weight out-dims


def _round_up(x: int, m: int) -> int:
    return ((x + m - 1) // m) * m


def _mlp_kernel(*refs, num_layers: int):
    """Fused [Linear -> ReLU] * num_layers, everything resident in VMEM.

    refs layout:
      refs[0]                      x_ref  (B, K)        f32, unpadded input
      refs[1 : 1+L]                w_refs (K_l, N_l)    bf16, per-layer padded
      refs[1+L : 1+2L]             b_refs (1, N_l)      f32,  per-layer padded
      refs[1+2L]                   o_ref  (B, N_last)   f32
    """
    x_ref = refs[0]
    w_refs = refs[1:1 + num_layers]
    b_refs = refs[1 + num_layers:1 + 2 * num_layers]
    o_ref = refs[1 + 2 * num_layers]

    # Cast once; activations stay bf16 into every MXU matmul.
    h = x_ref[...].astype(jnp.bfloat16)
    act = None
    for layer in range(num_layers):  # static unroll, L known at trace time
        y = jnp.dot(h, w_refs[layer][...], preferred_element_type=jnp.float32)
        # f32 accumulate + bias + ReLU epilogue (v5e-friendly).
        act = jnp.maximum(y + b_refs[layer][...], 0.0)
        if layer + 1 < num_layers:
            h = act.astype(jnp.bfloat16)
    o_ref[...] = act


@functools.partial(jax.jit, static_argnames=("out_dim",))
def generator_forward(x, w_list, b_list, *, out_dim):
    """x: (B, input_dim) f32; w_list/b_list from pack_generator_params."""
    w_list = tuple(w_list)
    b_list = tuple(b_list)
    num_layers = len(w_list)
    B = x.shape[0]
    p_out = w_list[-1].shape[1]  # lane-padded last hidden dim (multiple of 128)

    flops = 2 * B * sum(w.shape[0] * w.shape[1] for w in w_list)
    bytes_accessed = (
        x.size * x.dtype.itemsize
        + sum(w.size * w.dtype.itemsize for w in w_list)
        + sum(b.size * b.dtype.itemsize for b in b_list)
        + B * p_out * 4)

    # TODO(synk): for non-toy batch sizes add a batch grid axis
    # (BlockSpec((TB, P), lambda i: (i, 0)) for x/out, weights constant-index
    # resident, dimension_semantics=("parallel",)) so both v7x TensorCores run.
    out = pl.pallas_call(
        functools.partial(_mlp_kernel, num_layers=num_layers),
        out_shape=jax.ShapeDtypeStruct((B, p_out), jnp.float32),
        in_specs=[pl.BlockSpec(memory_space=pltpu.MemorySpace.VMEM)]
        * (1 + 2 * num_layers),
        out_specs=pl.BlockSpec(memory_space=pltpu.MemorySpace.VMEM),
        cost_estimate=pl.CostEstimate(
            flops=flops, transcendentals=0, bytes_accessed=bytes_accessed),
    )(x, *w_list, *b_list)

    # Slice back to the logical (unpadded) output width.
    return out[:, :out_dim]


def init_generator_params(key, input_dim, hidden_dims, dtype=jnp.float32):
    """Deterministic init mimicking nn.Linear default (uniform +-1/sqrt(fan_in)).

    Weights are stored as [in_dim, out_dim] (transpose of PyTorch's [out, in])
    so the kernel computes x @ W + b directly.
    """
    params = []
    prev = input_dim
    for h in hidden_dims:
        key, kw, kb = jax.random.split(key, 3)
        bound = 1.0 / (prev ** 0.5)
        w = jax.random.uniform(kw, (prev, h), dtype, minval=-bound, maxval=bound)
        b = jax.random.uniform(kb, (1, h), dtype, minval=-bound, maxval=bound)
        params.append((w, b))
        prev = h
    return params


def pack_generator_params(params, weight_dtype=jnp.bfloat16):
    """Per-layer padding (not a uniform Pmax x Pmax stack).

    Layer l weight (K_l, N_l) is padded to:
      in-dim : K_l untouched for layer 0 (contract against the real input
               width); round_up(K_l, 128) for layers >= 1 so it matches the
               previous layer's lane-padded activation width.
      out-dim: round_up(N_l, 128) -> lane-dense MXU tiles and unmasked stores.
    Padded weight rows/cols and padded bias lanes are 0, so padded activation
    lanes stay exactly 0 through the whole stack.
    """
    w_list, b_list = [], []
    resident_bytes = 0
    for layer, (w, b) in enumerate(params):
        k, n = w.shape
        kp = k if layer == 0 else _round_up(k, LANE)
        np_ = _round_up(n, LANE)
        wp = jnp.zeros((kp, np_), weight_dtype).at[:k, :n].set(
            w.astype(weight_dtype))
        bp = jnp.zeros((1, np_), jnp.float32).at[:, :n].set(
            b.astype(jnp.float32))
        w_list.append(wp)
        b_list.append(bp)
        resident_bytes += (wp.size * jnp.dtype(weight_dtype).itemsize
                           + bp.size * 4)

    # VMEM budget guard: all weights resident must stay well under the
    # default scoped VMEM (32 MiB; v7x has only 64 MiB physical per TC).
    assert resident_bytes < 32 * 1024 * 1024, (
        "all-weights-resident design exceeds the VMEM budget; "
        "tile over layers instead")
    return tuple(w_list), tuple(b_list)


def _reference(x, params):
    """Pure-JAX reference in the same reduced precision as the kernel:
    bf16 matmul operands, f32 accumulate, f32 bias + ReLU."""
    h = x.astype(jnp.bfloat16)
    out = None
    for w, b in params:
        y = jnp.dot(h, w.astype(jnp.bfloat16),
                    preferred_element_type=jnp.float32)
        out = jnp.maximum(y + b.astype(jnp.float32), 0.0)
        h = out.astype(jnp.bfloat16)
    return out


def _run_case(key, batch, input_dim, hidden_dims):
    key, kx = jax.random.split(key)
    x = jax.random.normal(kx, (batch, input_dim), dtype=jnp.float32)
    params = init_generator_params(key, input_dim, hidden_dims)
    w_list, b_list = pack_generator_params(params)

    out = generator_forward(x, w_list, b_list, out_dim=hidden_dims[-1])
    out = jax.block_until_ready(out)

    ref = _reference(x, params)
    assert out.shape == (batch, hidden_dims[-1]), out.shape
    max_err = float(jnp.max(jnp.abs(out - ref)))
    assert jnp.allclose(out, ref, atol=1e-3, rtol=1e-3), max_err
    return max_err


if __name__ == "__main__":
    key = jax.random.PRNGKey(0)
    k1, k2 = jax.random.split(key)

    # Case 1: the original toy config (B multiple of 8, out_dim == 128).
    _run_case(k1, batch=8, input_dim=32, hidden_dims=[64, 128])

    # Case 2: exercises the previously untested paths:
    #   B not a multiple of 8, out_dim < 128, heterogeneous hidden widths.
    _run_case(k2, batch=6, input_dim=16, hidden_dims=[48, 96])

    print("KERNEL_OK")
</pallas_src>

<mosaic_0001>
module attributes {stable_mosaic.version = 11 : i64} {
  func.func @_mlp_kernel(%arg0: memref<8x32xf32, #tpu.memory_space<vmem>>, %arg1: memref<32x128xbf16, #tpu.memory_space<vmem>>, %arg2: memref<128x128xbf16, #tpu.memory_space<vmem>>, %arg3: memref<1x128xf32, #tpu.memory_space<vmem>>, %arg4: memref<1x128xf32, #tpu.memory_space<vmem>>, %arg5: memref<8x128xf32, #tpu.memory_space<vmem>>) attributes {dimension_semantics = [], scalar_prefetch = 0 : i64, scratch_operands = 0 : i64, tpu.core_type = #tpu.core_type<tc>} {
    %c0 = arith.constant 0 : index
    %c0_0 = arith.constant 0 : index
    %0 = vector.load %arg0[%c0, %c0_0] : memref<8x32xf32, #tpu.memory_space<vmem>>, vector<8x32xf32>
    %1 = arith.truncf %0 : vector<8x32xf32> to vector<8x32xbf16>
    %c0_1 = arith.constant 0 : index
    %c0_2 = arith.constant 0 : index
    %2 = vector.load %arg1[%c0_1, %c0_2] : memref<32x128xbf16, #tpu.memory_space<vmem>>, vector<32x128xbf16>
    %cst = arith.constant dense<0.000000e+00> : vector<8x128xf32>
    %3 = tpu.matmul %1, %2, %cst {dimension_numbers = #tpu.dot_dimension_numbers<[1], [0], [0], [1], [0, 0, 1, 1], [], []>} : vector<8x32xbf16>, vector<32x128xbf16>, vector<8x128xf32> -> vector<8x128xf32>
    %c0_3 = arith.constant 0 : index
    %c0_4 = arith.constant 0 : index
    %4 = vector.load %arg3[%c0_3, %c0_4] : memref<1x128xf32, #tpu.memory_space<vmem>>, vector<1x128xf32>
    %5 = vector.broadcast %4 : vector<1x128xf32> to vector<8x128xf32>
    %6 = arith.addf %3, %5 : vector<8x128xf32>
    %cst_5 = arith.constant 0.000000e+00 : f32
    %7 = vector.broadcast %cst_5 : f32 to vector<8x128xf32>
    %8 = arith.maximumf %6, %7 : vector<8x128xf32>
    %9 = arith.truncf %8 : vector<8x128xf32> to vector<8x128xbf16>
    %c0_6 = arith.constant 0 : index
    %c0_7 = arith.constant 0 : index
    %10 = vector.load %arg2[%c0_6, %c0_7] : memref<128x128xbf16, #tpu.memory_space<vmem>>, vector<128x128xbf16>
    %cst_8 = arith.constant dense<0.000000e+00> : vector<8x128xf32>
    %11 = tpu.matmul %9, %10, %cst_8 {dimension_numbers = #tpu.dot_dimension_numbers<[1], [0], [0], [1], [0, 0, 1, 1], [], []>} : vector<8x128xbf16>, vector<128x128xbf16>, vector<8x128xf32> -> vector<8x128xf32>
    %c0_9 = arith.constant 0 : index
    %c0_10 = arith.constant 0 : index
    %12 = vector.load %arg4[%c0_9, %c0_10] : memref<1x128xf32, #tpu.memory_space<vmem>>, vector<1x128xf32>
    %13 = vector.broadcast %12 : vector<1x128xf32> to vector<8x128xf32>
    %14 = arith.addf %11, %13 : vector<8x128xf32>
    %cst_11 = arith.constant 0.000000e+00 : f32
    %15 = vector.broadcast %cst_11 : f32 to vector<8x128xf32>
    %16 = arith.maximumf %14, %15 : vector<8x128xf32>
    %c0_12 = arith.constant 0 : index
    %c0_13 = arith.constant 0 : index
    %17 = vector.load %arg5[%c0_12, %c0_13] : memref<8x128xf32, #tpu.memory_space<vmem>>, vector<8x128xf32>
    tpu.vector_store %arg5[%c0_12, %c0_13], %16 {strides = array<i32>} : memref<8x128xf32, #tpu.memory_space<vmem>>, vector<8x128xf32>,
    return
  }
}

</mosaic_0001>

<bundles_post_ra>
// kernel: generator_forward.1
= control target key start
LH: loop header
LB: loop body
LE: loop exit
PB: predicated region body
PF: predicated region fallthrough
CT: control target
= control target key end

     0   :  { %10 = vsyncpa [#allocation3], 0  ;;  %s524_s0 = inlined_call_operand.hbm [shape: f32[8,32], index: 0, kind: input, shape index: {}]   ;;  %s525_s1 = inlined_call_operand.hbm [shape: bf16[32,128], index: 1, kind: input, shape index: {}]   ;;  %s526_s2 = inlined_call_operand.hbm [shape: bf16[128,128], index: 2, kind: input, shape index: {}]   ;;  %s527_s3 = inlined_call_operand.vmem [shape: f32[1,128], index: 3, kind: input, shape index: {}]   ;;  %s528_s4 = inlined_call_operand.vmem [shape: f32[1,128], index: 4, kind: input, shape index: {}]   ;;  %s529_s5 = inlined_call_operand.hbm [shape: f32[8,128], index: 5, kind: output, shape index: {}]  }
   0x1   :  { %11 = vsyncpa [#allocation6], 0 }
   0x2   :  { %12 = vsyncpa [#allocation4], 0  ;;  %s426_s18 = smov [#allocation5]   ;;  %s332_s22 = scalar_lea.hbm %s525_s1, 256 }
   0x3   :  { %s28_s19 = sshll.u32 %s426_s18, 4  ;;  %p333_p0 = scmp.ne.s32.totalorder %s525_s1, %s332_s22  ;;  %s29_s19 = int_to_ptr.vmem [resolvable:$true] %s28_s19 }
   0x4   :  { %p336_p1 = scmp.lt.u32.totalorder %s332_s22, %s525_s1 }
   0x6   :  { %p338_p2 = pnand %p336_p1, %p333_p0 }
   0x8   :  { %341 = shalt.err (!%p338_p2)
}
   0x9   :  { %s342_s27 = scalar_lea.vmem %s29_s19, 256  ;;  %p347_p4 = scmp.lt.s32.totalorder %s29_s19, %s29_s19 }
   0xa   :  { %p343_p3 = scmp.ne.s32.totalorder %s29_s19, %s342_s27  ;;  %p348_p5 = scmp.lt.s32.totalorder %s342_s27, %s342_s27 }
   0xc   :  { %p349_p6 = por %p348_p5, %p347_p4 }
   0xe   :  { %p350_p7 = pnand %p349_p6, %p343_p3 }
  0x10   :  { %353 = shalt.err (!%p350_p7)
}
  0x11   :  { %s427_s28 = smov 64   ;;  %s428_s29 = smov 4  }
  0x12   :  { %34 = dma.hbm_to_vmem [thread:$0]  %s525_s1, 256, %s29_s19, [#allocation6], %s427_s28, %s427_s28, %s428_s29  }
  0x13   :  { %s429_s7 = smov [#allocation2]   ;;  %s430_s9 = smov [#allocation7]  }
  0x14   :  { %s19_s8 = sshll.u32 %s429_s7, 4  ;;  %s40_s10 = sshll.u32 %s430_s9, 4  ;;  %s20_s8 = int_to_ptr.vmem [resolvable:$true] %s19_s8  ;;  %s41_s10 = int_to_ptr.vmem [resolvable:$true] %s40_s10 }
  0x15   :  { %s354_s13 = scalar_lea.hbm %s524_s0, 128 }
  0x16   :  { %p355_p8 = scmp.ne.s32.totalorder %s524_s0, %s354_s13  ;;  %p358_p9 = scmp.lt.u32.totalorder %s354_s13, %s524_s0 }
  0x18   :  { %p360_p10 = pnand %p358_p9, %p355_p8 }
  0x1a   :  { %363 = shalt.err (!%p360_p10)
}
  0x1b   :  { %s364_s1 = scalar_lea.vmem %s20_s8, 128  ;;  %p369_p12 = scmp.lt.s32.totalorder %s20_s8, %s20_s8 }
  0x1c   :  { %p365_p11 = scmp.ne.s32.totalorder %s20_s8, %s364_s1  ;;  %p370_p13 = scmp.lt.s32.totalorder %s364_s1, %s364_s1 }
  0x1e   :  { %p371_p0 = por %p370_p13, %p369_p12 }
  0x20   :  { %p372_p1 = pnand %p371_p0, %p365_p11 }
  0x22   :  { %375 = shalt.err (!%p372_p1)
}
  0x23   :  { %22 = dma.hbm_to_vmem [thread:$0]  %s524_s0, 128, %s20_s8, [#allocation3]  }
  0x24   :  { %s376_s22 = scalar_lea.hbm %s526_s2, 1024 }
  0x25   :  { %p377_p2 = scmp.ne.s32.totalorder %s526_s2, %s376_s22  ;;  %p380_p3 = scmp.lt.u32.totalorder %s376_s22, %s526_s2 }
  0x27   :  { %p382_p4 = pnand %p380_p3, %p377_p2 }
  0x29   :  { %385 = shalt.err (!%p382_p4)
}
  0x2a   :  { %s386_s27 = scalar_lea.vmem %s41_s10, 1024  ;;  %p391_p6 = scmp.lt.s32.totalorder %s41_s10, %s41_s10 }
  0x2b   :  { %p387_p5 = scmp.ne.s32.totalorder %s41_s10, %s386_s27  ;;  %p392_p7 = scmp.lt.s32.totalorder %s386_s27, %s386_s27 }
  0x2d   :  { %p393_p8 = por %p392_p7, %p391_p6 }
  0x2f   :  { %p394_p9 = pnand %p393_p8, %p387_p5 }
  0x31   :  { %397 = shalt.err (!%p394_p9)
}
  0x32   :  { %46 = dma.hbm_to_vmem [thread:$0]  %s526_s2, 1024, %s41_s10, [#allocation6], %s427_s28, %s427_s28, %s428_s29  }
  0x33   :  { %420 = dma.done.wait [#allocation3], 128  }
  0x34   :  { %421 = vsyncadd [#allocation3], 4294967168 }
  0x35   :  { %422 = dma.done.wait [#allocation6], 1280  }
  0x36   :  { %423 = vsyncadd [#allocation6], 4294966016  ;;  %v431_v0 = vmov 0.0   ;;  %vm432_vm0 = vmmov 0   ;;  %v322_v1 = vld [vmem:[#allocation5] sm:$0xff]   ;;  %v323_v2 = vld [vmem:[#allocation5 + $0x8] sm:$0xff]  }
  0x37   :  { %286 = vmatprep.subr.bf16.mxu0 %v431_v0  ;;  %290 = vmatprep.mubr.msk.bf16.mxu0 %vm432_vm0, %v431_v0  ;;  %v61_v3 = vld [vmem:[#allocation2] sm:$0xff]  ;;  %v324_v4 = vld [vmem:[#allocation7] sm:$0xff]   ;;  %vm86_vm1 = vcmask 261120   ;;  %v326_v7 = vld [vmem:[#allocation7 + $0x10] sm:$0xff]   ;;  %s433_s7 = smov [#allocation8]  }
  0x38   :  { %294 = vmatprep.subr.bf16.mxu1 %v431_v0  ;;  %310 = vmatprep.mubr.msk.bf16.mxu1 %vm432_vm0, %v431_v0  ;;  %v62_v5 = vpack.c.bf16 %v61_v3, %v61_v3  ;;  %v325_v6 = vld [vmem:[#allocation7 + $0x8] sm:$0xff]   ;;  %v327_v8 = vld [vmem:[#allocation7 + $0x18] sm:$0xff]   ;;  %v328_v9 = vld [vmem:[#allocation7 + $0x20] sm:$0xff]   ;;  %s251_s8 = sshll.u32 %s433_s7, 4  ;;  %s252_s8 = int_to_ptr.vmem [resolvable:$true] %s251_s8 }
  0x39   :  { %287 = vmatpush3.bf16.msra.mxu0 %v322_v1  ;;  %295 = vmatpush3.bf16.msra.mxu1 %v324_v4  ;;  %v329_v10 = vld [vmem:[#allocation7 + $0x28] sm:$0xff]   ;;  %v330_v11 = vld [vmem:[#allocation7 + $0x30] sm:$0xff]   ;;  %v331_v12 = vld [vmem:[#allocation7 + $0x38] sm:$0xff]   ;;  %p403_p11 = scmp.lt.s32.totalorder %s252_s8, %s252_s8 }
  0x3a   :  { %288 = vmatprep.subr.bf16.mxu0 %v431_v0  ;;  %296 = vmatprep.subr.bf16.mxu1 %v431_v0  ;;  %v261_v13 = vld [vmem:[%s527_s3] ss:$0 sm:$0xff]  ;;  %s398_s3 = scalar_lea.vmem %s252_s8, 128 }
  0x3b   :  { %v265_v21 = vld [vmem:[%s528_s4] ss:$0 sm:$0xff]  ;;  %p399_p10 = scmp.ne.s32.totalorder %s252_s8, %s398_s3  ;;  %p404_p12 = scmp.lt.s32.totalorder %s398_s3, %s398_s3 }
  0x3d   :  { %289 = vmatpush3.bf16.msra.mxu0 %v323_v2  ;;  %297 = vmatpush3.bf16.msra.mxu1 %v325_v6  ;;  %p405_p13 = por %p404_p12, %p403_p11 }
  0x3e   :  { %298 = vmatprep.subr.bf16.mxu1 %v431_v0 }
  0x3f   :  { %p406_p0 = pnand %p405_p13, %p399_p10 }
  0x40   :  { %291 = vmatmul.mubr.msk.bf16.vlgmr.msra.gmra.mrb[0].mxu0 %vm86_vm1, %v62_v5 }
  0x41   :  { %299 = vmatpush3.bf16.msra.mxu1 %v326_v7 }
  0x42   :  { %300 = vmatprep.subr.bf16.mxu1 %v431_v0 }
  0x45   :  { %301 = vmatpush3.bf16.msra.mxu1 %v327_v8 }
  0x46   :  { %302 = vmatprep.subr.bf16.mxu1 %v431_v0 }
  0x49   :  { %303 = vmatpush3.bf16.msra.mxu1 %v328_v9 }
  0x4a   :  { %304 = vmatprep.subr.bf16.mxu1 %v431_v0 }
  0x4d   :  { %305 = vmatpush3.bf16.msra.mxu1 %v329_v10 }
  0x4e   :  { %306 = vmatprep.subr.bf16.mxu1 %v431_v0 }
  0x51   :  { %307 = vmatpush3.bf16.msra.mxu1 %v330_v11 }
  0x52   :  { %308 = vmatprep.subr.bf16.mxu1 %v431_v0 }
  0x55   :  { %309 = vmatpush3.bf16.msra.mxu1 %v331_v12 }
 0x113   :  { %v124_v14 = vpop.f32.mrb[0].mxu0 }
 0x114   :  { %v125_v15 = vadd.f32 %v261_v13, %v124_v14  ;;  %v292_v16 = vpop.f32.mrb[1].mxu0 }
 0x115   :  { %v127_v17 = vpop.f32.mrb[2].mxu0 }
 0x116   :  { %v130_v18 = vmax.f32 %v125_v15, 0.0  ;;  %v293_v19 = vpop.f32.mrb[3].mxu0 }
 0x118   :  { %v131_v20 = vpack.c.bf16 %v130_v18, %v130_v18 }
 0x11a   :  { %311 = vmatmul.mubr.bf16.vlgmr.msra.gmra.mrb[0].mxu1 %v131_v20 }
 0x1ed   :  { %v237_v22 = vpop.f32.mrb[0].mxu1 }
 0x1ee   :  { %v238_v23 = vadd.f32 %v265_v21, %v237_v22  ;;  %v312_v24 = vpop.f32.mrb[1].mxu1 }
 0x1ef   :  { %v240_v25 = vpop.f32.mrb[2].mxu1 }
 0x1f0   :  { %v243_v26 = vmax.f32 %v238_v23, 0.0  ;;  %v313_v27 = vpop.f32.mrb[3].mxu1 }
 0x1f2   :  { %244 = vst [vmem:[#allocation8] sm:$0xff] %v243_v26 }
 0x1f3   :  { %409 = shalt.err (!%p406_p0)
}
 0x1f4   :  { %s410_s4 = scalar_lea.hbm %s529_s5, 128 }
 0x1f5   :  { %p411_p1 = scmp.ne.s32.totalorder %s529_s5, %s410_s4  ;;  %p414_p2 = scmp.lt.u32.totalorder %s410_s4, %s529_s5 }
 0x1f7   :  { %p416_p3 = pnand %p414_p2, %p411_p1 }
 0x1f9   :  { %419 = shalt.err (!%p416_p3)
}
 0x1fa   :  { %254 = dma.vmem_to_hbm [thread:$0]  %s252_s8, 128, %s529_s5, [#allocation4]  }
 0x1fb   :  { %424 = dma.done.wait [#allocation4], 128  }
 0x1fc   :  { %425 = vsyncadd [#allocation4], 4294967168 }
 0x1fd   :  { %258 = vsyncpa [#allocation3], 1 }
 0x1fe   :  { %259 = vsyncpa [#allocation6], 1 }
 0x1ff   :  { %260 = vsyncpa [#allocation4], 1 }

</bundles_post_ra>
